<compile_context>
chip_gen: v7x
topology: tpu7x:2x2x1
jax: 0.10.0
libtpu: 0.0.40
codegen_flags: <defaults>
</compile_context>

<pallas_src>
import jax
import jax.numpy as jnp
from jax.experimental import pallas as pl
from jax.experimental.pallas import tpu as pltpu

# ---------------- configuration (shapes implied by the wrapper) -------------
B, C, H, W = 2, 4, 16, 16          # small NCHW input
IN_FEATURES = C * H * W            # 1024
NUM_FEATURES = 32                  # get_embedding_size(model_name) -> embedding dim
NUM_CLASSES = 10                   # classifier head width
DUMMY_CLASS_INDICES = (1, 3, 5, 7) # register_buffer('dummy_classes_indices', ...)
BATCH_TILE = 128                   # batch tile for the large-batch grid path


# ---------------- Pallas kernel: the backbone hot path ----------------------
def _backbone_kernel(x_ref, w1_ref, b1_ref, w2_ref, b2_ref, out_ref):
    """out = relu(x @ W1 + b1) @ W2 + b2.

    x arrives f32 and is cast to bf16 in-kernel (VPU cast hidden under DMA
    slack); W1 is stored bf16. Both dots are explicit bf16 x bf16 -> f32
    accumulation on the MXU. Bias add / ReLU stay f32 (v5e-safe).
    """
    x_bf16 = x_ref[...].astype(jnp.bfloat16)
    h = jnp.dot(x_bf16, w1_ref[...],
                preferred_element_type=jnp.float32)       # [bt, NUM_FEATURES] f32
    h = jnp.maximum(h + b1_ref[...], 0.0)                 # f32 bias + ReLU (VPU)
    logits = jnp.dot(h.astype(jnp.bfloat16),
                     w2_ref[...].astype(jnp.bfloat16),
                     preferred_element_type=jnp.float32)  # [bt, n_out] f32
    out_ref[...] = (logits + b2_ref[...]).astype(out_ref.dtype)


def backbone_forward(x_flat, w1, b1, w2, b2, *, batch_tile=BATCH_TILE):
    """Run the synthetic backbone on a flattened [B, IN] f32 input."""
    batch, in_features = x_flat.shape
    n_hidden = w1.shape[1]
    n_out = w2.shape[1]

    flops = 2 * batch * in_features * n_hidden + 2 * batch * n_hidden * n_out
    bytes_accessed = (
        x_flat.size * x_flat.dtype.itemsize
        + w1.size * w1.dtype.itemsize
        + b1.size * b1.dtype.itemsize
        + w2.size * w2.dtype.itemsize
        + b2.size * b2.dtype.itemsize
        + batch * n_out * 4
    )
    cost = pl.CostEstimate(flops=flops, bytes_accessed=bytes_accessed,
                           transcendentals=0)
    out_shape = jax.ShapeDtypeStruct((batch, n_out), jnp.float32)

    if batch > batch_tile and batch % batch_tile == 0:
        # Batch-tiled path: one pallas_call for the whole batch; only x / out
        # are tiled along the batch axis, weights + biases are full-extent
        # blocks (same block index every step -> resident in VMEM).
        nb = batch // batch_tile
        return pl.pallas_call(
            _backbone_kernel,
            out_shape=out_shape,
            grid=(nb,),
            in_specs=[
                pl.BlockSpec((batch_tile, in_features), lambda i: (i, 0)),
                pl.BlockSpec((in_features, n_hidden),   lambda i: (0, 0)),
                pl.BlockSpec((1, n_hidden),             lambda i: (0, 0)),
                pl.BlockSpec((n_hidden, n_out),         lambda i: (0, 0)),
                pl.BlockSpec((1, n_out),                lambda i: (0, 0)),
            ],
            out_specs=pl.BlockSpec((batch_tile, n_out), lambda i: (i, 0)),
            # No megacore split at these sizes: a few hundred rows per step is
            # latency-bound work; cross-core sharding would only add overhead.
            compiler_params=pltpu.CompilerParams(
                dimension_semantics=("arbitrary",)),
            cost_estimate=cost,
        )(x_flat, w1, b1, w2, b2)

    # Tiny-batch path: whole problem (~70 KB) fits one VMEM block, no grid.
    vmem = pl.BlockSpec(memory_space=pltpu.MemorySpace.VMEM)
    return pl.pallas_call(
        _backbone_kernel,
        out_shape=out_shape,
        in_specs=[vmem, vmem, vmem, vmem, vmem],
        out_specs=vmem,
        cost_estimate=cost,
    )(x_flat, w1, b1, w2, b2)


# ---------------- MySimpleWrapper equivalent --------------------------------
class MySimpleWrapperJAX:
    def __init__(self, params, prune_output=True,
                 dummy_classes_indices=DUMMY_CLASS_INDICES):
        w1, b1, w2, b2 = params
        self.prune_output = prune_output
        # register_buffer('dummy_classes_indices', torch.LongTensor([...]))
        self.dummy_classes_indices = jnp.asarray(dummy_classes_indices,
                                                 dtype=jnp.int32)
        # W1 dominates HBM traffic -> store bf16 (MXU-native, f32 accum in kernel).
        self.w1 = w1.astype(jnp.bfloat16)
        self.b1 = b1
        if prune_output:
            # Fuse logits[:, dummy_classes_indices] into the classifier head:
            # the indices are a static buffer, so pre-slicing W2/b2 is exact.
            self.w2 = w2[:, self.dummy_classes_indices]
            self.b2 = b2[:, self.dummy_classes_indices]
        else:
            # prune_output=False path keeps the full NUM_CLASSES head.
            self.w2 = w2
            self.b2 = b2

    def forward(self, x_nchw):
        # NCHW -> flatten to [B, C*H*W] (row-major, matches torch .view).
        # Stay f32 here: the bf16 cast happens inside the kernel so no extra
        # HBM copy / XLA op is emitted at the call boundary.
        b = x_nchw.shape[0]
        x_flat = x_nchw.reshape(b, -1)
        return backbone_forward(x_flat, self.w1, self.b1, self.w2, self.b2)


# ---------------- deterministic parameter init ------------------------------
def init_params(key):
    k1, k2, k3, k4 = jax.random.split(key, 4)
    w1 = jax.random.normal(k1, (IN_FEATURES, NUM_FEATURES), jnp.float32) * 0.02
    b1 = jax.random.normal(k2, (1, NUM_FEATURES), jnp.float32) * 0.01
    w2 = jax.random.normal(k3, (NUM_FEATURES, NUM_CLASSES), jnp.float32) * 0.02
    b2 = jax.random.normal(k4, (1, NUM_CLASSES), jnp.float32) * 0.01
    return (w1, b1, w2, b2)


def _reference(x_nchw, params, idx=None):
    """Pure-JAX reference with the same bf16 quantization as the kernel."""
    w1, b1, w2, b2 = params
    b = x_nchw.shape[0]
    x_bf = x_nchw.reshape(b, -1).astype(jnp.bfloat16)
    h = jnp.dot(x_bf, w1.astype(jnp.bfloat16),
                preferred_element_type=jnp.float32)
    h = jnp.maximum(h + b1, 0.0)
    w2_use = w2 if idx is None else w2[:, idx]
    b2_use = b2 if idx is None else b2[:, idx]
    logits = jnp.dot(h.astype(jnp.bfloat16), w2_use.astype(jnp.bfloat16),
                     preferred_element_type=jnp.float32) + b2_use
    return logits


if __name__ == "__main__":
    key = jax.random.PRNGKey(0)
    pkey, xkey, xkey_big = jax.random.split(key, 3)

    params = init_params(pkey)
    x = jax.random.normal(xkey, (B, C, H, W), jnp.float32)   # NCHW input

    # ---- prune_output=True path (gather fused into W2/b2), tiny batch ------
    wrapper = MySimpleWrapperJAX(params, prune_output=True)
    out = jax.block_until_ready(wrapper.forward(x))
    ref = _reference(x, params, idx=wrapper.dummy_classes_indices)
    assert out.shape == (B, len(DUMMY_CLASS_INDICES))
    assert jnp.allclose(out, ref, atol=1e-3, rtol=1e-3)

    # ---- prune_output=False path (full 10-class head retained) -------------
    wrapper_full = MySimpleWrapperJAX(params, prune_output=False)
    out_full = jax.block_until_ready(wrapper_full.forward(x))
    ref_full = _reference(x, params, idx=None)
    assert out_full.shape == (B, NUM_CLASSES)
    assert jnp.allclose(out_full, ref_full, atol=1e-3, rtol=1e-3)

    # ---- large-batch path: one pallas_call, batch grid, resident weights ---
    B_LARGE = 2 * BATCH_TILE
    x_big = jax.random.normal(xkey_big, (B_LARGE, C, H, W), jnp.float32)
    out_big = jax.block_until_ready(wrapper.forward(x_big))
    ref_big = _reference(x_big, params, idx=wrapper.dummy_classes_indices)
    assert out_big.shape == (B_LARGE, len(DUMMY_CLASS_INDICES))
    assert jnp.allclose(out_big, ref_big, atol=1e-3, rtol=1e-3)

    print("KERNEL_OK")
</pallas_src>

<mosaic_0001>
module attributes {stable_mosaic.version = 11 : i64} {
  func.func @_backbone_kernel(%arg0: memref<2x1024xf32, #tpu.memory_space<vmem>>, %arg1: memref<1024x32xbf16, #tpu.memory_space<vmem>>, %arg2: memref<1x32xf32, #tpu.memory_space<vmem>>, %arg3: memref<32x4xf32, #tpu.memory_space<vmem>>, %arg4: memref<1x4xf32, #tpu.memory_space<vmem>>, %arg5: memref<2x4xf32, #tpu.memory_space<vmem>>) attributes {dimension_semantics = [], scalar_prefetch = 0 : i64, scratch_operands = 0 : i64, tpu.core_type = #tpu.core_type<tc>} {
    %c0 = arith.constant 0 : index
    %c0_0 = arith.constant 0 : index
    %0 = vector.load %arg0[%c0, %c0_0] : memref<2x1024xf32, #tpu.memory_space<vmem>>, vector<2x1024xf32>
    %1 = arith.truncf %0 : vector<2x1024xf32> to vector<2x1024xbf16>
    %c0_1 = arith.constant 0 : index
    %c0_2 = arith.constant 0 : index
    %2 = vector.load %arg1[%c0_1, %c0_2] : memref<1024x32xbf16, #tpu.memory_space<vmem>>, vector<1024x32xbf16>
    %cst = arith.constant dense<0.000000e+00> : vector<2x32xf32>
    %3 = tpu.matmul %1, %2, %cst {dimension_numbers = #tpu.dot_dimension_numbers<[1], [0], [0], [1], [0, 0, 1, 1], [], []>} : vector<2x1024xbf16>, vector<1024x32xbf16>, vector<2x32xf32> -> vector<2x32xf32>
    %c0_3 = arith.constant 0 : index
    %c0_4 = arith.constant 0 : index
    %4 = vector.load %arg2[%c0_3, %c0_4] : memref<1x32xf32, #tpu.memory_space<vmem>>, vector<1x32xf32>
    %5 = vector.broadcast %4 : vector<1x32xf32> to vector<2x32xf32>
    %6 = arith.addf %3, %5 : vector<2x32xf32>
    %cst_5 = arith.constant 0.000000e+00 : f32
    %7 = vector.broadcast %cst_5 : f32 to vector<2x32xf32>
    %8 = arith.maximumf %6, %7 : vector<2x32xf32>
    %9 = arith.truncf %8 : vector<2x32xf32> to vector<2x32xbf16>
    %c0_6 = arith.constant 0 : index
    %c0_7 = arith.constant 0 : index
    %10 = vector.load %arg3[%c0_6, %c0_7] : memref<32x4xf32, #tpu.memory_space<vmem>>, vector<32x4xf32>
    %11 = arith.truncf %10 : vector<32x4xf32> to vector<32x4xbf16>
    %cst_8 = arith.constant dense<0.000000e+00> : vector<2x4xf32>
    %12 = tpu.matmul %9, %11, %cst_8 {dimension_numbers = #tpu.dot_dimension_numbers<[1], [0], [0], [1], [0, 0, 1, 1], [], []>} : vector<2x32xbf16>, vector<32x4xbf16>, vector<2x4xf32> -> vector<2x4xf32>
    %c0_9 = arith.constant 0 : index
    %c0_10 = arith.constant 0 : index
    %13 = vector.load %arg4[%c0_9, %c0_10] : memref<1x4xf32, #tpu.memory_space<vmem>>, vector<1x4xf32>
    %14 = vector.broadcast %13 : vector<1x4xf32> to vector<2x4xf32>
    %15 = arith.addf %12, %14 : vector<2x4xf32>
    %c0_11 = arith.constant 0 : index
    %c0_12 = arith.constant 0 : index
    %16 = vector.load %arg5[%c0_11, %c0_12] : memref<2x4xf32, #tpu.memory_space<vmem>>, vector<2x4xf32>
    tpu.vector_store %arg5[%c0_11, %c0_12], %15 {strides = array<i32>} : memref<2x4xf32, #tpu.memory_space<vmem>>, vector<2x4xf32>,
    return
  }
}

</mosaic_0001>

<bundles_post_ra>
// kernel: tpu_custom_call.1
= control target key start
LH: loop header
LB: loop body
LE: loop exit
PB: predicated region body
PF: predicated region fallthrough
CT: control target
= control target key end

     0   :  { %v30_v28 = vlaneseq  ;;  %v1090_v36 = vmov 1983009808   ;;  %s1358_s0 = inlined_call_operand.vmem [shape: f32[2,1024], index: 0, kind: input, shape index: {}]   ;;  %s1359_s1 = inlined_call_operand.vmem [shape: bf16[1024,32], index: 1, kind: input, shape index: {}]   ;;  %s1360_s2 = inlined_call_operand.vmem [shape: f32[1,32], index: 2, kind: input, shape index: {}]   ;;  %s1361_s3 = inlined_call_operand.vmem [shape: f32[32,4], index: 3, kind: input, shape index: {}]   ;;  %s1362_s4 = inlined_call_operand.vmem [shape: f32[1,4], index: 4, kind: input, shape index: {}]   ;;  %s1363_s5 = inlined_call_operand.hbm [shape: f32[2,4], index: 5, kind: output, shape index: {}]  }
   0x1   :  { %v1000_v0 = vld [vmem:[%s1359_s1 + $0x40] sm:$0xff]   ;;  %v1004_v4 = vld [vmem:[%s1359_s1 + $0x48] sm:$0xff]   ;;  %v1008_v8 = vld [vmem:[%s1359_s1 + $0x50] sm:$0xff]   ;;  %v28_v37 = vunpack.c.l.s4 %v1090_v36 }
   0x2   :  { %v1001_v1 = vld [vmem:[%s1359_s1 + $0xc0] sm:$0xff]   ;;  %897 = vmatprep.subr.bf16.mxu0 %v1000_v0  ;;  %v1005_v5 = vld [vmem:[%s1359_s1 + $0xc8] sm:$0xff]   ;;  %v1009_v9 = vld [vmem:[%s1359_s1 + $0xd0] sm:$0xff]   ;;  %v31_v33 = vshrl.u32 %v30_v28, 7 }
   0x3   :  { %v1002_v2 = vld [vmem:[%s1359_s1] sm:$0xff]   ;;  %919 = vmatprep.subr.bf16.mxu1 %v1001_v1  ;;  %v1006_v6 = vld [vmem:[%s1359_s1 + $0x8] sm:$0xff]   ;;  %v1010_v10 = vld [vmem:[%s1359_s1 + $0x10] sm:$0xff]   ;;  %v29_v39 = vunpack.c.0.s8 %v28_v37 }
   0x4   :  { %v1003_v3 = vld [vmem:[%s1359_s1 + $0x80] sm:$0xff]   ;;  %898 = vmatpush3.bf16.msra.mxu0 %v1002_v2  ;;  %v1007_v7 = vld [vmem:[%s1359_s1 + $0x88] sm:$0xff]   ;;  %v1011_v11 = vld [vmem:[%s1359_s1 + $0x90] sm:$0xff]  }
   0x5   :  { %920 = vmatpush3.bf16.msra.mxu1 %v1003_v3  ;;  %899 = vmatprep.subr.bf16.mxu0 %v1004_v4  ;;  %v1012_v12 = vld [vmem:[%s1359_s1 + $0x58] sm:$0xff]   ;;  %v1016_v16 = vld [vmem:[%s1359_s1 + $0x60] sm:$0xff]   ;;  %v1020_v20 = vld [vmem:[%s1359_s1 + $0x68] sm:$0xff]   ;;  %v1229_v41 = vsub.s32 %v29_v39, %v31_v33 }
   0x6   :  { %921 = vmatprep.subr.bf16.mxu1 %v1005_v5  ;;  %v1013_v13 = vld [vmem:[%s1359_s1 + $0xd8] sm:$0xff]   ;;  %v1017_v17 = vld [vmem:[%s1359_s1 + $0xe0] sm:$0xff]   ;;  %v1021_v21 = vld [vmem:[%s1359_s1 + $0xe8] sm:$0xff]  }
   0x7   :  { %v1014_v14 = vld [vmem:[%s1359_s1 + $0x18] sm:$0xff]   ;;  %v1018_v18 = vld [vmem:[%s1359_s1 + $0x20] sm:$0xff]   ;;  %v1022_v22 = vld [vmem:[%s1359_s1 + $0x28] sm:$0xff]  }
   0x8   :  { %900 = vmatpush3.bf16.msra.mxu0 %v1006_v6  ;;  %v1015_v15 = vld [vmem:[%s1359_s1 + $0x98] sm:$0xff]   ;;  %v1019_v19 = vld [vmem:[%s1359_s1 + $0xa0] sm:$0xff]   ;;  %v1023_v23 = vld [vmem:[%s1359_s1 + $0xa8] sm:$0xff]  }
   0x9   :  { %922 = vmatpush3.bf16.msra.mxu1 %v1007_v7  ;;  %901 = vmatprep.subr.bf16.mxu0 %v1008_v8  ;;  %v1024_v24 = vld [vmem:[%s1359_s1 + $0x70] sm:$0xff]   ;;  %v1028_v29 = vld [vmem:[%s1359_s1 + $0x78] sm:$0xff]   ;;  %v22_v34 = vld [vmem:[%s1358_s0] sm:$0xff] }
   0xa   :  { %923 = vmatprep.subr.bf16.mxu1 %v1009_v9  ;;  %v1025_v25 = vld [vmem:[%s1359_s1 + $0xf0] sm:$0xff]   ;;  %v1029_v30 = vld [vmem:[%s1359_s1 + $0xf8] sm:$0xff]   ;;  %v1033_v35 = vld [vmem:[%s1359_s1 + $0x140] sm:$0xff]   ;;  %v26_v40 = vcombine.high %v22_v34, %v22_v34  ;;  %v33_v42 = vrot.slane %v22_v34, %v1229_v41 }
   0xb   :  { %v1026_v26 = vld [vmem:[%s1359_s1 + $0x30] sm:$0xff]   ;;  %v1030_v31 = vld [vmem:[%s1359_s1 + $0x38] sm:$0xff]   ;;  %v1034_v38 = vld [vmem:[%s1359_s1 + $0x1c0] sm:$0xff]  }
   0xc   :  { %902 = vmatpush3.bf16.msra.mxu0 %v1010_v10  ;;  %v1027_v27 = vld [vmem:[%s1359_s1 + $0xb0] sm:$0xff]   ;;  %v1031_v32 = vld [vmem:[%s1359_s1 + $0xb8] sm:$0xff]   ;;  %v40_v43 = vrot.slane %v26_v40, %v1229_v41  ;;  %v41_v44 = vcombine.high %v33_v42, %v33_v42  ;;  %v1035_v46 = vld [vmem:[%s1359_s1 + $0x100] sm:$0xff]   ;;  %v68_v47 = vpack.c.bf16 %v33_v42, %v33_v42 }
   0xd   :  { %924 = vmatpush3.bf16.msra.mxu1 %v1011_v11  ;;  %903 = vmatprep.subr.bf16.mxu0 %v1012_v12  ;;  %v1036_v49 = vld [vmem:[%s1359_s1 + $0x180] sm:$0xff]   ;;  %v1037_v52 = vld [vmem:[%s1359_s1 + $0x148] sm:$0xff]   ;;  %v1041_v56 = vld [vmem:[%s1359_s1 + $0x150] sm:$0xff]  }
   0xe   :  { %925 = vmatprep.subr.bf16.mxu1 %v1013_v13  ;;  %v42_v45 = vcombine.high %v40_v43, %v40_v43  ;;  %v70_v48 = vpack.c.bf16 %v40_v43, %v40_v43  ;;  %v69_v50 = vpack.c.bf16 %v41_v44, %v41_v44  ;;  %v1038_v53 = vld [vmem:[%s1359_s1 + $0x1c8] sm:$0xff]   ;;  %v1042_v57 = vld [vmem:[%s1359_s1 + $0x1d0] sm:$0xff]   ;;  %v1045_v60 = vld [vmem:[%s1359_s1 + $0x158] sm:$0xff]  }
   0xf   :  { %v1039_v54 = vld [vmem:[%s1359_s1 + $0x108] sm:$0xff]   ;;  %v1043_v58 = vld [vmem:[%s1359_s1 + $0x110] sm:$0xff]   ;;  %v1046_v61 = vld [vmem:[%s1359_s1 + $0x1d8] sm:$0xff]  }
  0x10   :  { %904 = vmatpush3.bf16.msra.mxu0 %v1014_v14  ;;  %v71_v51 = vpack.c.bf16 %v42_v45, %v42_v45  ;;  %627 = vmatprep.mubr.bf16.mxu0 %v69_v50  ;;  %v1040_v55 = vld [vmem:[%s1359_s1 + $0x188] sm:$0xff]   ;;  %v1044_v59 = vld [vmem:[%s1359_s1 + $0x190] sm:$0xff]   ;;  %v1047_v62 = vld [vmem:[%s1359_s1 + $0x118] sm:$0xff]  }
  0x11   :  { %926 = vmatpush3.bf16.msra.mxu1 %v1015_v15  ;;  %905 = vmatprep.subr.bf16.mxu0 %v1016_v16  ;;  %v1048_v63 = vld [vmem:[%s1359_s1 + $0x198] sm:$0xff]   ;;  %v1049_v0 = vld [vmem:[%s1359_s1 + $0x160] sm:$0xff]   ;;  %v1053_v4 = vld [vmem:[%s1359_s1 + $0x168] sm:$0xff]  }
  0x12   :  { %927 = vmatprep.subr.bf16.mxu1 %v1017_v17  ;;  %667 = vmatprep.mubr.bf16.mxu1 %v71_v51  ;;  %v1050_v1 = vld [vmem:[%s1359_s1 + $0x1e0] sm:$0xff]   ;;  %v1054_v5 = vld [vmem:[%s1359_s1 + $0x1e8] sm:$0xff]   ;;  %v1057_v8 = vld [vmem:[%s1359_s1 + $0x170] sm:$0xff]  }
  0x13   :  { %v1051_v2 = vld [vmem:[%s1359_s1 + $0x120] sm:$0xff]   ;;  %v1055_v6 = vld [vmem:[%s1359_s1 + $0x128] sm:$0xff]   ;;  %v1058_v9 = vld [vmem:[%s1359_s1 + $0x1f0] sm:$0xff]  }
  0x14   :  { %906 = vmatpush3.bf16.msra.mxu0 %v1018_v18  ;;  %v1052_v3 = vld [vmem:[%s1359_s1 + $0x1a0] sm:$0xff]   ;;  %v1056_v7 = vld [vmem:[%s1359_s1 + $0x1a8] sm:$0xff]  }
  0x15   :  { %928 = vmatpush3.bf16.msra.mxu1 %v1019_v19  ;;  %907 = vmatprep.subr.bf16.mxu0 %v1020_v20  ;;  %v23_v10 = vld [vmem:[%s1358_s0 + $0x8] sm:$0xff] }
  0x16   :  { %929 = vmatprep.subr.bf16.mxu1 %v1021_v21 }
  0x18   :  { %908 = vmatpush3.bf16.msra.mxu0 %v1022_v22 }
  0x19   :  { %930 = vmatpush3.bf16.msra.mxu1 %v1023_v23  ;;  %909 = vmatprep.subr.bf16.mxu0 %v1024_v24 }
  0x1a   :  { %931 = vmatprep.subr.bf16.mxu1 %v1025_v25 }
  0x1c   :  { %910 = vmatpush3.bf16.msra.mxu0 %v1026_v26 }
  0x1d   :  { %932 = vmatpush3.bf16.msra.mxu1 %v1027_v27  ;;  %911 = vmatprep.subr.bf16.mxu0 %v1028_v29 }
  0x1e   :  { %933 = vmatprep.subr.bf16.mxu1 %v1029_v30 }
  0x20   :  { %912 = vmatpush3.bf16.msra.mxu0 %v1030_v31 }
  0x21   :  { %934 = vmatpush3.bf16.msra.mxu1 %v1031_v32  ;;  %941 = vmatprep.subr.bf16.mxu0 %v1033_v35 }
  0x22   :  { %963 = vmatprep.subr.bf16.mxu1 %v1034_v38 }
  0x23   :  { %628 = vmatmul.mubr.bf16.vlgmr.msra.gmra.mrb[0].mxu0 %v68_v47 }
  0x24   :  { %668 = vmatmul.mubr.bf16.vlgmr.msra.gmra.mrb[0].mxu1 %v70_v48  ;;  %942 = vmatpush3.bf16.msra.mxu0 %v1035_v46 }
  0x25   :  { %964 = vmatpush3.bf16.msra.mxu1 %v1036_v49  ;;  %943 = vmatprep.subr.bf16.mxu0 %v1037_v52 }
  0x26   :  { %965 = vmatprep.subr.bf16.mxu1 %v1038_v53 }
  0x28   :  { %944 = vmatpush3.bf16.msra.mxu0 %v1039_v54 }
  0x29   :  { %966 = vmatpush3.bf16.msra.mxu1 %v1040_v55  ;;  %945 = vmatprep.subr.bf16.mxu0 %v1041_v56 }
  0x2a   :  { %967 = vmatprep.subr.bf16.mxu1 %v1042_v57 }
  0x2c   :  { %946 = vmatpush3.bf16.msra.mxu0 %v1043_v58 }
  0x2d   :  { %968 = vmatpush3.bf16.msra.mxu1 %v1044_v59  ;;  %947 = vmatprep.subr.bf16.mxu0 %v1045_v60 }
  0x2e   :  { %969 = vmatprep.subr.bf16.mxu1 %v1046_v61 }
  0x30   :  { %948 = vmatpush3.bf16.msra.mxu0 %v1047_v62 }
  0x31   :  { %970 = vmatpush3.bf16.msra.mxu1 %v1048_v63  ;;  %949 = vmatprep.subr.bf16.mxu0 %v1049_v0 }
  0x32   :  { %971 = vmatprep.subr.bf16.mxu1 %v1050_v1 }
  0x34   :  { %950 = vmatpush3.bf16.msra.mxu0 %v1051_v2 }
  0x35   :  { %972 = vmatpush3.bf16.msra.mxu1 %v1052_v3  ;;  %951 = vmatprep.subr.bf16.mxu0 %v1053_v4 }
  0x36   :  { %973 = vmatprep.subr.bf16.mxu1 %v1054_v5 }
  0x37   :  { %10 = vsyncpa [#allocation3], 0  ;;  %v50_v11 = vrot.slane %v23_v10, %v1229_v41  ;;  %v43_v12 = vcombine.high %v23_v10, %v23_v10  ;;  %v1059_v13 = vld [vmem:[%s1359_s1 + $0x130] sm:$0xff]   ;;  %v1061_v17 = vld [vmem:[%s1359_s1 + $0x178] sm:$0xff]   ;;  %v1091_v29 = vmov 0.0   ;;  %vm1092_vm0 = vmmov 0  }
  0x38   :  { %952 = vmatpush3.bf16.msra.mxu0 %v1055_v6  ;;  %v1060_v14 = vld [vmem:[%s1359_s1 + $0x1b0] sm:$0xff]   ;;  %v1062_v18 = vld [vmem:[%s1359_s1 + $0x1f8] sm:$0xff]   ;;  %v757_v26 = vld [vmem:[%s1361_s3] sm:$0xff]  ;;  %vm770_vm1 = vcmask 261120   ;;  %s1093_s8 = smov [#allocation2]   ;;  %vm814_vm2 = vcmask 25600  }
  0x39   :  { %974 = vmatpush3.bf16.msra.mxu1 %v1056_v7  ;;  %v58_v15 = vcombine.high %v50_v11, %v50_v11  ;;  %v57_v16 = vrot.slane %v43_v12, %v1229_v41  ;;  %953 = vmatprep.subr.bf16.mxu0 %v1057_v8  ;;  %v1063_v21 = vld [vmem:[%s1359_s1 + $0x138] sm:$0xff]   ;;  %v72_v24 = vpack.c.bf16 %v50_v11, %v50_v11  ;;  %v758_v27 = vld [vmem:[%s1361_s3 + $0x8] sm:$0xff]  ;;  %v759_v30 = vld [vmem:[%s1361_s3 + $0x10] sm:$0xff]  ;;  %s822_s9 = sshll.u32 %s1093_s8, 4  ;;  %s823_s9 = int_to_ptr.vmem [resolvable:$true] %s822_s9 }
  0x3a   :  { %975 = vmatprep.subr.bf16.mxu1 %v1058_v9  ;;  %v1064_v22 = vld [vmem:[%s1359_s1 + $0x1b8] sm:$0xff]   ;;  %v761_v28 = vpack.c.bf16 %v758_v27, %v757_v26  ;;  %v830_v35 = vld [vmem:[%s1360_s2] ss:$0 sm:$0xff]  ;;  %s1066_s10 = scalar_lea.vmem %s823_s9, 32  ;;  %p1071_p1 = scmp.lt.s32.totalorder %s823_s9, %s823_s9 }
  0x3b   :  { %v73_v19 = vpack.c.bf16 %v58_v15, %v58_v15  ;;  %v59_v20 = vcombine.high %v57_v16, %v57_v16  ;;  %v74_v25 = vpack.c.bf16 %v57_v16, %v57_v16  ;;  %v760_v31 = vld [vmem:[%s1361_s3 + $0x18] sm:$0xff]  ;;  %v895_v60 = vld [vmem:[%s1362_s4] ss:$0 sm:$0xff]  ;;  %p1067_p0 = scmp.ne.s32.totalorder %s823_s9, %s1066_s10  ;;  %p1072_p2 = scmp.lt.s32.totalorder %s1066_s10, %s1066_s10 }
  0x3c   :  { %954 = vmatpush3.bf16.msra.mxu0 %v1059_v13  ;;  %v762_v32 = vpack.c.bf16 %v760_v31, %v759_v30 }
  0x3d   :  { %976 = vmatpush3.bf16.msra.mxu1 %v1060_v14  ;;  %v75_v23 = vpack.c.bf16 %v59_v20, %v59_v20  ;;  %955 = vmatprep.subr.bf16.mxu0 %v1061_v17  ;;  %p1073_p3 = por %p1072_p2, %p1071_p1 }
  0x3e   :  { %977 = vmatprep.subr.bf16.mxu1 %v1062_v18  ;;  %707 = vmatprep.mubr.bf16.mxu0 %v73_v19 }
  0x3f   :  { %747 = vmatprep.mubr.bf16.mxu1 %v75_v23  ;;  %p1074_p4 = pnand %p1073_p3, %p1067_p0 }
  0x40   :  { %956 = vmatpush3.bf16.msra.mxu0 %v1063_v21 }
  0x41   :  { %978 = vmatpush3.bf16.msra.mxu1 %v1064_v22  ;;  %988 = vmatprep.subr.bf16.mxu0 %v1091_v29 }
  0x43   :  { %708 = vmatmul.mubr.bf16.vlgmr.msra.gmra.mrb[4].mxu0 %v72_v24 }
  0x44   :  { %748 = vmatmul.mubr.bf16.vlgmr.msra.gmra.mrb[4].mxu1 %v74_v25  ;;  %989 = vmatpush3.bf16.msra.mxu0 %v761_v28 }
  0x45   :  { %990 = vmatprep.subr.bf16.mxu0 %v1091_v29  ;;  %992 = vmatprep.mubr.msk.bf16.mxu0 %vm1092_vm0, %v1091_v29 }
  0x48   :  { %991 = vmatpush3.bf16.msra.mxu0 %v762_v32 }
  0xf6   :  { %v913_v33 = vpop.f32.mrb[0].mxu0 }
  0xf7   :  { %v935_v34 = vpop.f32.mrb[0].mxu1  ;;  %v914_v36 = vpop.f32.mrb[1].mxu0 }
  0xf8   :  { %v936_v37 = vpop.f32.mrb[1].mxu1  ;;  %v915_v38 = vadd.f32 %v914_v36, %v913_v33  ;;  %v916_v40 = vpop.f32.mrb[2].mxu0 }
  0xf9   :  { %v937_v39 = vadd.f32 %v936_v37, %v935_v34  ;;  %v938_v41 = vpop.f32.mrb[2].mxu1  ;;  %v917_v42 = vpop.f32.mrb[3].mxu0 }
  0xfa   :  { %v939_v43 = vpop.f32.mrb[3].mxu1  ;;  %v630_v44 = vadd.f32 %v915_v38, %v830_v35 }
  0xfc   :  { %v670_v45 = vadd.f32 %v937_v39, %v630_v44 }
 0x116   :  { %v957_v46 = vpop.f32.mrb[4].mxu0 }
 0x117   :  { %v979_v47 = vpop.f32.mrb[4].mxu1  ;;  %v958_v48 = vpop.f32.mrb[5].mxu0 }
 0x118   :  { %v980_v49 = vpop.f32.mrb[5].mxu1  ;;  %v959_v50 = vadd.f32 %v958_v48, %v957_v46  ;;  %v960_v52 = vpop.f32.mrb[6].mxu0 }
 0x119   :  { %v981_v51 = vadd.f32 %v980_v49, %v979_v47  ;;  %v982_v53 = vpop.f32.mrb[6].mxu1  ;;  %v961_v54 = vpop.f32.mrb[7].mxu0 }
 0x11a   :  { %v983_v55 = vpop.f32.mrb[7].mxu1  ;;  %v710_v56 = vadd.f32 %v959_v50, %v670_v45 }
 0x11c   :  { %v750_v57 = vadd.f32 %v981_v51, %v710_v56 }
 0x11e   :  { %v755_v58 = vmax.f32 %v750_v57, 0.0 }
 0x120   :  { %v756_v59 = vpack.c.bf16 %v755_v58, %v755_v58 }
 0x122   :  { %993 = vmatmul.mubr.msk.bf16.vlgmr.msra.gmra.mrb[8].mxu0 %vm770_vm1, %v756_v59 }
 0x1f5   :  { %v808_v61 = vpop.f32.mrb[8].mxu0 }
 0x1f6   :  { %v809_v62 = vadd.f32 %v895_v60, %v808_v61  ;;  %v994_v63 = vpop.f32.mrb[9].mxu0 }
 0x1f7   :  { %v811_v0 = vpop.f32.mrb[10].mxu0 }
 0x1f8   :  { %v995_v1 = vpop.f32.mrb[11].mxu0  ;;  %815 = vst.msk [vmem:[#allocation2] sm:$0x3] %vm814_vm2, %v809_v62 }
 0x1f9   :  { %1077 = shalt.err (!%p1074_p4)
}
 0x1fa   :  { %s1078_s4 = scalar_lea.hbm %s1363_s5, 32 }
 0x1fb   :  { %p1079_p5 = scmp.ne.s32.totalorder %s1363_s5, %s1078_s4  ;;  %p1082_p6 = scmp.lt.u32.totalorder %s1078_s4, %s1363_s5 }
 0x1fd   :  { %p1084_p7 = pnand %p1082_p6, %p1079_p5 }
 0x1ff   :  { %1087 = shalt.err (!%p1084_p7)
}
 0x200   :  { %825 = dma.vmem_to_hbm [thread:$0]  %s823_s9, 32, %s1363_s5, [#allocation3]  }
 0x201   :  { %1088 = dma.done.wait [#allocation3], 32  }
 0x202   :  { %1089 = vsyncadd [#allocation3], 4294967264 }
 0x203   :  { %829 = vsyncpa [#allocation3], 1 }

</bundles_post_ra>
